<compile_context>
chip_gen: v7x
topology: tpu7x:2x2x1
jax: 0.10.0
libtpu: 0.0.40
codegen_flags: <defaults>
</compile_context>

<pallas_src>
import functools
import math

import jax
import jax.numpy as jnp
from jax.experimental import pallas as pl
from jax.experimental.pallas import tpu as pltpu


def _round_up(x, m):
    return ((x + m - 1) // m) * m


# ----------------------------------------------------------------------------
# Pallas kernel: full Critic forward for one batch tile
# ----------------------------------------------------------------------------
def critic_kernel(sr,                      # static: width of the states branch
                  x_ref,                   # (TM, K0p) bf16 [states | actions_cat | 0]
                  w0_ref, b0_ref,          # fused fcs/fca: (K0p, H0p) bf16, (1, H0p) f32
                  w1_ref, b1_ref,          # fc1: (H0p, F1p) bf16, (1, F1p) f32
                  w2_ref, b2_ref,          # fc2: (F1p, F2p) bf16, (1, F2p) f32
                  w3_ref, b3_ref,          # fc3: (F2p, Rp)  bf16, (1, Rp)  f32
                  out_ref):                # (TM, Rp) f32 lane-dense output
    # Fused branch matmul: h0 = [relu(fcs(states)) | fca(actions_cat) | 0-pad]
    # bf16 operands, f32 accumulation; bias / ReLU in f32.
    h0 = jnp.dot(x_ref[...], w0_ref[...],
                 preferred_element_type=jnp.float32) + b0_ref[...]
    # ReLU only on the states-branch lanes [0, sr).  Build the mask as a
    # (1, H0p) compare and let jnp.where broadcast it across sublanes.
    col = jax.lax.broadcasted_iota(jnp.int32, (1, h0.shape[1]), 1)
    h0 = jnp.where(col < sr, jnp.maximum(h0, 0.0), h0)

    # fc1 + relu
    h1 = jnp.maximum(
        jnp.dot(h0.astype(jnp.bfloat16), w1_ref[...],
                preferred_element_type=jnp.float32) + b1_ref[...],
        0.0)

    # fc2 + relu
    h2 = jnp.maximum(
        jnp.dot(h1.astype(jnp.bfloat16), w2_ref[...],
                preferred_element_type=jnp.float32) + b2_ref[...],
        0.0)

    # fc3 (no activation); padded lanes are zero by construction.
    out = jnp.dot(h2.astype(jnp.bfloat16), w3_ref[...],
                  preferred_element_type=jnp.float32) + b3_ref[...]
    out_ref[...] = out.astype(out_ref.dtype)


# ----------------------------------------------------------------------------
# Parameter initialization (deterministic, mirrors the PyTorch init scheme)
# ----------------------------------------------------------------------------
def _linear_params(key, in_f, out_f, w_bound=None):
    """PyTorch nn.Linear params.  Weight stored torch-style: (out_f, in_f)."""
    kw, kb = jax.random.split(key)
    if w_bound is None:
        # initialize_weights / rl_ibounds: uniform(-1/sqrt(out_f), +1/sqrt(out_f))
        w_bound = 1.0 / math.sqrt(out_f)
    w = jax.random.uniform(kw, (out_f, in_f), jnp.float32, -w_bound, w_bound)
    b_bound = 1.0 / math.sqrt(in_f)  # default PyTorch bias init
    b = jax.random.uniform(kb, (out_f,), jnp.float32, -b_bound, b_bound)
    return w, b


def init_critic_params(key, n_rewards, state_size, action_size,
                       fc1_units=400, fc2_units=300):
    keys = jax.random.split(key, 5)
    fca_w, fca_b = _linear_params(keys[0], action_size * n_rewards, state_size)
    fcs_w, fcs_b = _linear_params(keys[1], state_size * n_rewards,
                                  state_size * n_rewards)
    fc1_w, fc1_b = _linear_params(keys[2], state_size * (1 + n_rewards), fc1_units)
    fc2_w, fc2_b = _linear_params(keys[3], fc1_units, fc2_units)
    # fc3: weight uniform(-3e-3, 3e-3), bias default
    fc3_w, fc3_b = _linear_params(keys[4], fc2_units, n_rewards, w_bound=3e-3)
    return dict(fca_w=fca_w, fca_b=fca_b, fcs_w=fcs_w, fcs_b=fcs_b,
                fc1_w=fc1_w, fc1_b=fc1_b, fc2_w=fc2_w, fc2_b=fc2_b,
                fc3_w=fc3_w, fc3_b=fc3_b)


# ----------------------------------------------------------------------------
# One-time parameter preparation: transpose, fuse branches, pad to 128, bf16
# ----------------------------------------------------------------------------
def prepare_critic_params(params, n_rewards, state_size, action_size):
    SR = state_size * n_rewards          # fcs in/out width
    AR = action_size * n_rewards         # fca in width
    S = state_size                       # fca out width
    F1 = params["fc1_w"].shape[0]
    F2 = params["fc2_w"].shape[0]
    K0 = SR + AR                         # fused input width
    H0 = SR + S                          # fused hidden width (= fc1 in width)

    K0p = _round_up(K0, 128)
    H0p = _round_up(H0, 128)
    F1p = _round_up(F1, 128)
    F2p = _round_up(F2, 128)
    Rp = _round_up(n_rewards, 128)

    # Fused block-diagonal branch weight: [states | actions_cat] -> [s_h | a_h]
    w0 = jnp.zeros((K0p, H0p), jnp.float32)
    w0 = w0.at[:SR, :SR].set(params["fcs_w"].T)
    w0 = w0.at[SR:SR + AR, SR:SR + S].set(params["fca_w"].T)
    b0 = jnp.zeros((1, H0p), jnp.float32)
    b0 = b0.at[0, :SR].set(params["fcs_b"])
    b0 = b0.at[0, SR:SR + S].set(params["fca_b"])

    def pad2(a, r, c):
        return jnp.pad(a, ((0, r - a.shape[0]), (0, c - a.shape[1])))

    w1 = pad2(params["fc1_w"].T, H0p, F1p)                # (H0p, F1p)
    b1 = pad2(params["fc1_b"][None, :], 1, F1p)
    w2 = pad2(params["fc2_w"].T, F1p, F2p)                # (F1p, F2p)
    b2 = pad2(params["fc2_b"][None, :], 1, F2p)
    w3 = pad2(params["fc3_w"].T, F2p, Rp)                 # (F2p, Rp)
    b3 = pad2(params["fc3_b"][None, :], 1, Rp)

    bf16 = jnp.bfloat16
    tensors = dict(
        w0=w0.astype(bf16), b0=b0,
        w1=w1.astype(bf16), b1=b1,
        w2=w2.astype(bf16), b2=b2,
        w3=w3.astype(bf16), b3=b3,
    )
    meta = (SR, K0, K0p, Rp, n_rewards)     # static ints
    return dict(tensors=tensors, meta=meta)


# ----------------------------------------------------------------------------
# Batch tiling: >= 2 tiles when possible (v7x megacore), minimal row padding
# ----------------------------------------------------------------------------
def _choose_batch_tiles(B, tm_cap):
    tm_cap = max(8, _round_up(tm_cap, 8))        # TM must be a multiple of 8
    B8 = _round_up(B, 8)
    n_tiles = pl.cdiv(B8, tm_cap)
    if n_tiles == 1 and B8 >= 16:
        n_tiles = 2                              # keep both v7x TCs busy
    TM = _round_up(pl.cdiv(B8, n_tiles), 8)
    B_pad = TM * n_tiles
    return TM, B_pad, n_tiles


# ----------------------------------------------------------------------------
# Wrapper: action row-block concat, batch padding/tiling, pallas_call
# ----------------------------------------------------------------------------
@functools.partial(jax.jit, static_argnames=("meta", "tm"))
def _critic_forward_jit(tensors, states, actions, *, meta, tm):
    SR, K0, K0p, Rp, n_rewards = meta
    B = states.shape[0]
    assert actions.shape[0] % B == 0, "opla size mismatch!!"
    delta = actions.shape[0] // B
    A = actions.shape[1]
    # fca expects width action_size * n_rewards, so delta must equal n_rewards.
    assert delta == n_rewards, "actions row-blocks must equal n_rewards"

    # torch.cat([actions[i*B:(i+1)*B, :] for i in range(delta)], dim=1)
    actions_cat = jnp.transpose(actions.reshape(delta, B, A),
                                (1, 0, 2)).reshape(B, delta * A)

    TM, B_pad, n_tiles = _choose_batch_tiles(B, tm)

    # Concatenated, zero-padded activation slab in bf16: (B_pad, K0p).
    # Built inside this jit so XLA fuses transpose/concat/pad/cast.
    x = jnp.concatenate([states, actions_cat], axis=1).astype(jnp.bfloat16)
    x = jnp.pad(x, ((0, B_pad - B), (0, K0p - K0)))

    const = lambda i: (0, 0)                 # weights/biases: VMEM-resident

    out = pl.pallas_call(
        functools.partial(critic_kernel, SR),
        out_shape=jax.ShapeDtypeStruct((B_pad, Rp), jnp.float32),
        grid=(n_tiles,),
        in_specs=[
            pl.BlockSpec((TM, K0p), lambda i: (i, 0)),     # streamed activations
            pl.BlockSpec(tensors["w0"].shape, const),
            pl.BlockSpec(tensors["b0"].shape, const),
            pl.BlockSpec(tensors["w1"].shape, const),
            pl.BlockSpec(tensors["b1"].shape, const),
            pl.BlockSpec(tensors["w2"].shape, const),
            pl.BlockSpec(tensors["b2"].shape, const),
            pl.BlockSpec(tensors["w3"].shape, const),
            pl.BlockSpec(tensors["b3"].shape, const),
        ],
        out_specs=pl.BlockSpec((TM, Rp), lambda i: (i, 0)),  # lane-dense output
        compiler_params=pltpu.CompilerParams(
            dimension_semantics=("parallel",)),
    )(x, tensors["w0"], tensors["b0"], tensors["w1"], tensors["b1"],
      tensors["w2"], tensors["b2"], tensors["w3"], tensors["b3"])

    # Strip batch padding and padded output lanes.
    return out[:B, :n_rewards]


def critic_forward(prep, states, actions, tm=2048):
    return _critic_forward_jit(prep["tensors"], states, actions,
                               meta=prep["meta"], tm=tm)


# ----------------------------------------------------------------------------
# Pure-JAX references (mirror the torch forward) for sanity checks
# ----------------------------------------------------------------------------
def _actions_cat(states, actions):
    B = states.shape[0]
    delta = actions.shape[0] // B
    A = actions.shape[1]
    return jnp.transpose(actions.reshape(delta, B, A),
                         (1, 0, 2)).reshape(B, delta * A)


def critic_ref_f32(params, states, actions):
    actions_cat = _actions_cat(states, actions)
    a_h = actions_cat @ params["fca_w"].T + params["fca_b"]
    s_h = jax.nn.relu(states @ params["fcs_w"].T + params["fcs_b"])
    xs = jnp.concatenate([s_h, a_h], axis=1)
    x = jax.nn.relu(xs @ params["fc1_w"].T + params["fc1_b"])
    x = jax.nn.relu(x @ params["fc2_w"].T + params["fc2_b"])
    return x @ params["fc3_w"].T + params["fc3_b"]


def critic_ref_bf16(params, states, actions):
    """Matches kernel numerics: bf16 matmul inputs, f32 accumulate, f32 bias/relu."""
    bf = jnp.bfloat16

    def lin(x, w, b):
        return jnp.dot(x.astype(bf), w.T.astype(bf),
                       preferred_element_type=jnp.float32) + b

    actions_cat = _actions_cat(states, actions)
    a_h = lin(actions_cat, params["fca_w"], params["fca_b"])
    s_h = jax.nn.relu(lin(states, params["fcs_w"], params["fcs_b"]))
    xs = jnp.concatenate([s_h, a_h], axis=1)
    x = jax.nn.relu(lin(xs, params["fc1_w"], params["fc1_b"]))
    x = jax.nn.relu(lin(x, params["fc2_w"], params["fc2_b"]))
    return lin(x, params["fc3_w"], params["fc3_b"])


if __name__ == "__main__":
    key = jax.random.PRNGKey(0)

    # Test 1: small toy shapes (single batch tile).
    n_rewards, state_size, action_size = 3, 8, 4
    fc1_units, fc2_units, batch = 32, 24, 2
    kp, ks, ka, key = jax.random.split(key, 4)
    params = init_critic_params(kp, n_rewards, state_size, action_size,
                                fc1_units, fc2_units)
    prep = prepare_critic_params(params, n_rewards, state_size, action_size)
    states = jax.random.normal(ks, (batch, state_size * n_rewards), jnp.float32)
    actions = jax.random.normal(ka, (batch * n_rewards, action_size), jnp.float32)
    out = critic_forward(prep, states, actions)
    jax.block_until_ready(out)
    assert out.shape == (batch, n_rewards)
    ref_bf = critic_ref_bf16(params, states, actions)
    ref_f32 = critic_ref_f32(params, states, actions)
    assert jnp.allclose(out, ref_bf, atol=1e-3, rtol=1e-2), \
        "mismatch vs bf16-matched reference (test 1)"
    assert jnp.allclose(out, ref_f32, atol=1e-2, rtol=1e-2), \
        "mismatch vs f32 reference (test 1)"

    # Test 2: default torch fc sizes, non-multiple-of-8 batch
    # (exercises row padding and the >=2-tile / megacore grid path).
    fc1_units, fc2_units, batch = 400, 300, 37
    kp, ks, ka, key = jax.random.split(key, 4)
    params = init_critic_params(kp, n_rewards, state_size, action_size,
                                fc1_units, fc2_units)
    prep = prepare_critic_params(params, n_rewards, state_size, action_size)
    states = jax.random.normal(ks, (batch, state_size * n_rewards), jnp.float32)
    actions = jax.random.normal(ka, (batch * n_rewards, action_size), jnp.float32)
    out = critic_forward(prep, states, actions)
    jax.block_until_ready(out)
    assert out.shape == (batch, n_rewards)
    ref_bf = critic_ref_bf16(params, states, actions)
    ref_f32 = critic_ref_f32(params, states, actions)
    assert jnp.allclose(out, ref_bf, atol=1e-3, rtol=1e-2), \
        "mismatch vs bf16-matched reference (test 2)"
    assert jnp.allclose(out, ref_f32, atol=1e-2, rtol=1e-2), \
        "mismatch vs f32 reference (test 2)"

    print("KERNEL_OK")
</pallas_src>

<mosaic_0001>
module attributes {stable_mosaic.version = 11 : i64} {
  func.func @critic_kernel(%arg0: i32, %arg1: memref<8x128xbf16, #tpu.memory_space<vmem>>, %arg2: memref<128x128xbf16, #tpu.memory_space<vmem>>, %arg3: memref<1x128xf32, #tpu.memory_space<vmem>>, %arg4: memref<128x128xbf16, #tpu.memory_space<vmem>>, %arg5: memref<1x128xf32, #tpu.memory_space<vmem>>, %arg6: memref<128x128xbf16, #tpu.memory_space<vmem>>, %arg7: memref<1x128xf32, #tpu.memory_space<vmem>>, %arg8: memref<128x128xbf16, #tpu.memory_space<vmem>>, %arg9: memref<1x128xf32, #tpu.memory_space<vmem>>, %arg10: memref<8x128xf32, #tpu.memory_space<vmem>>) attributes {dimension_semantics = [#tpu.dimension_semantics<parallel>], iteration_bounds = array<i64: 1>, scalar_prefetch = 0 : i64, scratch_operands = 0 : i64, tpu.core_type = #tpu.core_type<tc>, window_params = [{transform_indices = @transform_0, window_bounds = array<i64: 8, 128>}, {pipeline_mode = #tpu.pipeline_mode<synchronous>, transform_indices = @transform_1, window_bounds = array<i64: 128, 128>}, {pipeline_mode = #tpu.pipeline_mode<synchronous>, transform_indices = @transform_2, window_bounds = array<i64: 1, 128>}, {pipeline_mode = #tpu.pipeline_mode<synchronous>, transform_indices = @transform_3, window_bounds = array<i64: 128, 128>}, {pipeline_mode = #tpu.pipeline_mode<synchronous>, transform_indices = @transform_4, window_bounds = array<i64: 1, 128>}, {pipeline_mode = #tpu.pipeline_mode<synchronous>, transform_indices = @transform_5, window_bounds = array<i64: 128, 128>}, {pipeline_mode = #tpu.pipeline_mode<synchronous>, transform_indices = @transform_6, window_bounds = array<i64: 1, 128>}, {pipeline_mode = #tpu.pipeline_mode<synchronous>, transform_indices = @transform_7, window_bounds = array<i64: 128, 128>}, {pipeline_mode = #tpu.pipeline_mode<synchronous>, transform_indices = @transform_8, window_bounds = array<i64: 1, 128>}, {transform_indices = @transform_9, window_bounds = array<i64: 8, 128>}]} {
    %c0 = arith.constant 0 : index
    %c0_0 = arith.constant 0 : index
    %0 = vector.load %arg1[%c0, %c0_0] : memref<8x128xbf16, #tpu.memory_space<vmem>>, vector<8x128xbf16>
    %c0_1 = arith.constant 0 : index
    %c0_2 = arith.constant 0 : index
    %1 = vector.load %arg2[%c0_1, %c0_2] : memref<128x128xbf16, #tpu.memory_space<vmem>>, vector<128x128xbf16>
    %cst = arith.constant dense<0.000000e+00> : vector<8x128xf32>
    %2 = tpu.matmul %0, %1, %cst {dimension_numbers = #tpu.dot_dimension_numbers<[1], [0], [0], [1], [0, 0, 1, 1], [], []>} : vector<8x128xbf16>, vector<128x128xbf16>, vector<8x128xf32> -> vector<8x128xf32>
    %c0_3 = arith.constant 0 : index
    %c0_4 = arith.constant 0 : index
    %3 = vector.load %arg3[%c0_3, %c0_4] : memref<1x128xf32, #tpu.memory_space<vmem>>, vector<1x128xf32>
    %4 = vector.broadcast %3 : vector<1x128xf32> to vector<8x128xf32>
    %5 = arith.addf %2, %4 : vector<8x128xf32>
    %6 = tpu.iota {dimensions = array<i32: 1>} : vector<1x128xi32>
    %c24_i32 = arith.constant 24 : i32
    %7 = vector.broadcast %c24_i32 : i32 to vector<1x128xi32>
    %8 = arith.cmpi slt, %6, %7 : vector<1x128xi32>
    %cst_5 = arith.constant 0.000000e+00 : f32
    %9 = vector.broadcast %cst_5 : f32 to vector<8x128xf32>
    %10 = arith.maximumf %5, %9 : vector<8x128xf32>
    %11 = vector.shape_cast %8 : vector<1x128xi1> to vector<1x128xi1>
    %12 = vector.broadcast %11 : vector<1x128xi1> to vector<8x128xi1>
    %13 = arith.select %12, %10, %5 : vector<8x128xi1>, vector<8x128xf32>
    %14 = arith.truncf %13 : vector<8x128xf32> to vector<8x128xbf16>
    %c0_6 = arith.constant 0 : index
    %c0_7 = arith.constant 0 : index
    %15 = vector.load %arg4[%c0_6, %c0_7] : memref<128x128xbf16, #tpu.memory_space<vmem>>, vector<128x128xbf16>
    %cst_8 = arith.constant dense<0.000000e+00> : vector<8x128xf32>
    %16 = tpu.matmul %14, %15, %cst_8 {dimension_numbers = #tpu.dot_dimension_numbers<[1], [0], [0], [1], [0, 0, 1, 1], [], []>} : vector<8x128xbf16>, vector<128x128xbf16>, vector<8x128xf32> -> vector<8x128xf32>
    %c0_9 = arith.constant 0 : index
    %c0_10 = arith.constant 0 : index
    %17 = vector.load %arg5[%c0_9, %c0_10] : memref<1x128xf32, #tpu.memory_space<vmem>>, vector<1x128xf32>
    %18 = vector.broadcast %17 : vector<1x128xf32> to vector<8x128xf32>
    %19 = arith.addf %16, %18 : vector<8x128xf32>
    %cst_11 = arith.constant 0.000000e+00 : f32
    %20 = vector.broadcast %cst_11 : f32 to vector<8x128xf32>
    %21 = arith.maximumf %19, %20 : vector<8x128xf32>
    %22 = arith.truncf %21 : vector<8x128xf32> to vector<8x128xbf16>
    %c0_12 = arith.constant 0 : index
    %c0_13 = arith.constant 0 : index
    %23 = vector.load %arg6[%c0_12, %c0_13] : memref<128x128xbf16, #tpu.memory_space<vmem>>, vector<128x128xbf16>
    %cst_14 = arith.constant dense<0.000000e+00> : vector<8x128xf32>
    %24 = tpu.matmul %22, %23, %cst_14 {dimension_numbers = #tpu.dot_dimension_numbers<[1], [0], [0], [1], [0, 0, 1, 1], [], []>} : vector<8x128xbf16>, vector<128x128xbf16>, vector<8x128xf32> -> vector<8x128xf32>
    %c0_15 = arith.constant 0 : index
    %c0_16 = arith.constant 0 : index
    %25 = vector.load %arg7[%c0_15, %c0_16] : memref<1x128xf32, #tpu.memory_space<vmem>>, vector<1x128xf32>
    %26 = vector.broadcast %25 : vector<1x128xf32> to vector<8x128xf32>
    %27 = arith.addf %24, %26 : vector<8x128xf32>
    %cst_17 = arith.constant 0.000000e+00 : f32
    %28 = vector.broadcast %cst_17 : f32 to vector<8x128xf32>
    %29 = arith.maximumf %27, %28 : vector<8x128xf32>
    %30 = arith.truncf %29 : vector<8x128xf32> to vector<8x128xbf16>
    %c0_18 = arith.constant 0 : index
    %c0_19 = arith.constant 0 : index
    %31 = vector.load %arg8[%c0_18, %c0_19] : memref<128x128xbf16, #tpu.memory_space<vmem>>, vector<128x128xbf16>
    %cst_20 = arith.constant dense<0.000000e+00> : vector<8x128xf32>
    %32 = tpu.matmul %30, %31, %cst_20 {dimension_numbers = #tpu.dot_dimension_numbers<[1], [0], [0], [1], [0, 0, 1, 1], [], []>} : vector<8x128xbf16>, vector<128x128xbf16>, vector<8x128xf32> -> vector<8x128xf32>
    %c0_21 = arith.constant 0 : index
    %c0_22 = arith.constant 0 : index
    %33 = vector.load %arg9[%c0_21, %c0_22] : memref<1x128xf32, #tpu.memory_space<vmem>>, vector<1x128xf32>
    %34 = vector.broadcast %33 : vector<1x128xf32> to vector<8x128xf32>
    %35 = arith.addf %32, %34 : vector<8x128xf32>
    %c0_23 = arith.constant 0 : index
    %c0_24 = arith.constant 0 : index
    %36 = vector.load %arg10[%c0_23, %c0_24] : memref<8x128xf32, #tpu.memory_space<vmem>>, vector<8x128xf32>
    tpu.vector_store %arg10[%c0_23, %c0_24], %35 {strides = array<i32>} : memref<8x128xf32, #tpu.memory_space<vmem>>, vector<8x128xf32>,
    return
  }
  func.func @transform_0(%arg0: i32) -> (i32, i32) {
    %c0_i32 = arith.constant 0 : i32
    %c0_i32_0 = arith.constant 0 : i32
    return %arg0, %c0_i32 : i32, i32
  }
  func.func @transform_1(%arg0: i32) -> (i32, i32) {
    %c0_i32 = arith.constant 0 : i32
    %c0_i32_0 = arith.constant 0 : i32
    %c0_i32_1 = arith.constant 0 : i32
    return %c0_i32, %c0_i32_0 : i32, i32
  }
  func.func @transform_2(%arg0: i32) -> (i32, i32) {
    %c0_i32 = arith.constant 0 : i32
    %c0_i32_0 = arith.constant 0 : i32
    %c0_i32_1 = arith.constant 0 : i32
    return %c0_i32, %c0_i32_0 : i32, i32
  }
  func.func @transform_3(%arg0: i32) -> (i32, i32) {
    %c0_i32 = arith.constant 0 : i32
    %c0_i32_0 = arith.constant 0 : i32
    %c0_i32_1 = arith.constant 0 : i32
    return %c0_i32, %c0_i32_0 : i32, i32
  }
  func.func @transform_4(%arg0: i32) -> (i32, i32) {
    %c0_i32 = arith.constant 0 : i32
    %c0_i32_0 = arith.constant 0 : i32
    %c0_i32_1 = arith.constant 0 : i32
    return %c0_i32, %c0_i32_0 : i32, i32
  }
  func.func @transform_5(%arg0: i32) -> (i32, i32) {
    %c0_i32 = arith.constant 0 : i32
    %c0_i32_0 = arith.constant 0 : i32
    %c0_i32_1 = arith.constant 0 : i32
    return %c0_i32, %c0_i32_0 : i32, i32
  }
  func.func @transform_6(%arg0: i32) -> (i32, i32) {
    %c0_i32 = arith.constant 0 : i32
    %c0_i32_0 = arith.constant 0 : i32
    %c0_i32_1 = arith.constant 0 : i32
    return %c0_i32, %c0_i32_0 : i32, i32
  }
  func.func @transform_7(%arg0: i32) -> (i32, i32) {
    %c0_i32 = arith.constant 0 : i32
    %c0_i32_0 = arith.constant 0 : i32
    %c0_i32_1 = arith.constant 0 : i32
    return %c0_i32, %c0_i32_0 : i32, i32
  }
  func.func @transform_8(%arg0: i32) -> (i32, i32) {
    %c0_i32 = arith.constant 0 : i32
    %c0_i32_0 = arith.constant 0 : i32
    %c0_i32_1 = arith.constant 0 : i32
    return %c0_i32, %c0_i32_0 : i32, i32
  }
  func.func @transform_9(%arg0: i32) -> (i32, i32) {
    %c0_i32 = arith.constant 0 : i32
    %c0_i32_0 = arith.constant 0 : i32
    return %arg0, %c0_i32 : i32, i32
  }
}

</mosaic_0001>

<bundles_post_ra>
// kernel: _critic_forward_jit.1
= control target key start
LH: loop header
LB: loop body
LE: loop exit
PB: predicated region body
PF: predicated region fallthrough
CT: control target
= control target key end

     0   :  { %14 = vsyncpa [#allocation3], 0  ;;  %s1038_s0 = inlined_call_operand.vmem [shape: bf16[8,128], index: 0, kind: input, shape index: {}]   ;;  %s1039_s1 = inlined_call_operand.hbm [shape: bf16[128,128], index: 1, kind: input, shape index: {}]   ;;  %s1040_s2 = inlined_call_operand.vmem [shape: f32[1,128], index: 2, kind: input, shape index: {}]   ;;  %s1041_s3 = inlined_call_operand.hbm [shape: bf16[128,128], index: 3, kind: input, shape index: {}]   ;;  %s1042_s4 = inlined_call_operand.vmem [shape: f32[1,128], index: 4, kind: input, shape index: {}]   ;;  %s1043_s5 = inlined_call_operand.vmem [shape: bf16[128,128], index: 5, kind: input, shape index: {}]   ;;  %s1044_s6 = inlined_call_operand.vmem [shape: f32[1,128], index: 6, kind: input, shape index: {}]   ;;  %s1045_s7 = inlined_call_operand.hbm [shape: bf16[128,128], index: 7, kind: input, shape index: {}]   ;;  %s1046_s8 = inlined_call_operand.hbm [shape: f32[1,128], index: 8, kind: input, shape index: {}]   ;;  %s1047_s9 = inlined_call_operand.vmem [shape: f32[8,128], index: 9, kind: output, shape index: {}]  }
   0x1   :  { %15 = vsyncpa [#allocation5], 0 }
   0x2   :  { %16 = vsyncpa [#allocation8], 0  ;;  %s837_s30 = smov [#allocation4]   ;;  %s838_s11 = smov [#allocation2]  }
   0x3   :  { %s38_s10 = sshll.u32 %s837_s30, 4  ;;  %s24_s12 = sshll.u32 %s838_s11, 4  ;;  %s39_s10 = int_to_ptr.vmem [resolvable:$true] %s38_s10  ;;  %s895_s12 = int_to_ptr.vmem [resolvable:$true] %s24_s12 }
   0x4   :  { %s743_s15 = scalar_lea.hbm %s1041_s3, 1024 }
   0x5   :  { %p744_p0 = scmp.ne.s32.totalorder %s1041_s3, %s743_s15  ;;  %p747_p1 = scmp.lt.u32.totalorder %s743_s15, %s1041_s3 }
   0x7   :  { %p749_p2 = pnand %p747_p1, %p744_p0 }
   0x9   :  { %752 = shalt.err (!%p749_p2)
}
   0xa   :  { %s753_s20 = scalar_lea.vmem %s39_s10, 1024  ;;  %p758_p4 = scmp.lt.s32.totalorder %s39_s10, %s39_s10 }
   0xb   :  { %p754_p3 = scmp.ne.s32.totalorder %s39_s10, %s753_s20  ;;  %p759_p5 = scmp.lt.s32.totalorder %s753_s20, %s753_s20 }
   0xd   :  { %p760_p6 = por %p759_p5, %p758_p4 }
   0xf   :  { %p761_p7 = pnand %p760_p6, %p754_p3 }
  0x11   :  { %764 = shalt.err (!%p761_p7)
}
  0x12   :  { %s839_s21 = smov 64   ;;  %s840_s22 = smov 4  }
  0x13   :  { %44 = dma.hbm_to_vmem [thread:$0]  %s1041_s3, 1024, %s39_s10, [#allocation5], %s839_s21, %s839_s21, %s840_s22  }
  0x14   :  { %s765_s27 = scalar_lea.hbm %s1039_s1, 1024 }
  0x15   :  { %p766_p8 = scmp.ne.s32.totalorder %s1039_s1, %s765_s27  ;;  %p769_p9 = scmp.lt.u32.totalorder %s765_s27, %s1039_s1 }
  0x17   :  { %p771_p10 = pnand %p769_p9, %p766_p8 }
  0x19   :  { %774 = shalt.err (!%p771_p10)
}
  0x1a   :  { %s775_s13 = scalar_lea.vmem %s895_s12, 1024  ;;  %p780_p12 = scmp.lt.s32.totalorder %s895_s12, %s895_s12 }
  0x1b   :  { %p776_p11 = scmp.ne.s32.totalorder %s895_s12, %s775_s13  ;;  %p781_p13 = scmp.lt.s32.totalorder %s775_s13, %s775_s13 }
  0x1d   :  { %p782_p0 = por %p781_p13, %p780_p12 }
  0x1f   :  { %p783_p1 = pnand %p782_p0, %p776_p11 }
  0x21   :  { %786 = shalt.err (!%p783_p1)
}
  0x22   :  { %30 = dma.hbm_to_vmem [thread:$0]  %s1039_s1, 1024, %s895_s12, [#allocation3], %s839_s21, %s839_s21, %s840_s22  }
  0x23   :  { %s841_s14 = smov [#allocation6]   ;;  %s842_s16 = smov [#allocation7]  }
  0x24   :  { %s56_s15 = sshll.u32 %s841_s14, 4  ;;  %s69_s17 = sshll.u32 %s842_s16, 4  ;;  %s57_s15 = int_to_ptr.vmem [resolvable:$true] %s56_s15  ;;  %s70_s17 = int_to_ptr.vmem [resolvable:$true] %s69_s17 }
  0x25   :  { %s787_s20 = scalar_lea.hbm %s1045_s7, 1024 }
  0x26   :  { %p788_p2 = scmp.ne.s32.totalorder %s1045_s7, %s787_s20  ;;  %p791_p3 = scmp.lt.u32.totalorder %s787_s20, %s1045_s7 }
  0x28   :  { %p793_p4 = pnand %p791_p3, %p788_p2 }
  0x2a   :  { %796 = shalt.err (!%p793_p4)
}
  0x2b   :  { %s797_s1 = scalar_lea.vmem %s57_s15, 1024  ;;  %p802_p6 = scmp.lt.s32.totalorder %s57_s15, %s57_s15 }
  0x2c   :  { %p798_p5 = scmp.ne.s32.totalorder %s57_s15, %s797_s1  ;;  %p803_p7 = scmp.lt.s32.totalorder %s797_s1, %s797_s1 }
  0x2e   :  { %p804_p8 = por %p803_p7, %p802_p6 }
  0x30   :  { %p805_p9 = pnand %p804_p8, %p798_p5 }
  0x32   :  { %808 = shalt.err (!%p805_p9)
}
  0x33   :  { %62 = dma.hbm_to_vmem [thread:$0]  %s1045_s7, 1024, %s57_s15, [#allocation5], %s839_s21, %s839_s21, %s840_s22  }
  0x34   :  { %s809_s30 = scalar_lea.hbm %s1046_s8, 16 }
  0x35   :  { %p810_p10 = scmp.ne.s32.totalorder %s1046_s8, %s809_s30  ;;  %p813_p11 = scmp.lt.u32.totalorder %s809_s30, %s1046_s8 }
  0x37   :  { %p815_p12 = pnand %p813_p11, %p810_p10 }
  0x39   :  { %818 = shalt.err (!%p815_p12)
}
  0x3a   :  { %s819_s14 = scalar_lea.vmem %s70_s17, 16  ;;  %s823_s16 = scalar_lea.vmem %s70_s17, 32 }
  0x3b   :  { %p820_p13 = scmp.ne.s32.totalorder %s70_s17, %s819_s14  ;;  %p824_p0 = scmp.lt.s32.totalorder %s70_s17, %s70_s17 }
  0x3c   :  { %p825_p1 = scmp.lt.s32.totalorder %s823_s16, %s819_s14 }
  0x3e   :  { %p826_p2 = por %p825_p1, %p824_p0 }
  0x40   :  { %p827_p3 = pnand %p826_p2, %p820_p13 }
  0x42   :  { %830 = shalt.err (!%p827_p3)
}
  0x43   :  { %72 = dma.hbm_to_vmem [thread:$0]  %s1046_s8, 16, %s70_s17, [#allocation8]  }
  0x44   :  { %831 = dma.done.wait [#allocation3], 1024  }
  0x45   :  { %832 = vsyncadd [#allocation3], 4294966272 }
  0x46   :  { %833 = dma.done.wait [#allocation5], 2048  }
  0x47   :  { %834 = vsyncadd [#allocation5], 4294965248 }
  0x48   :  { %835 = dma.done.wait [#allocation8], 16  }
  0x49   :  { %836 = vsyncadd [#allocation8], 4294967280  ;;  %v843_v0 = vmov 0.0   ;;  %vm844_vm0 = vmmov 0   ;;  %v711_v1 = vld [vmem:[#allocation2] sm:$0xff]   ;;  %v712_v2 = vld [vmem:[#allocation2 + $0x8] sm:$0xff]   ;;  %v198_v24 = vlaneseq }
  0x4a   :  { %623 = vmatprep.subr.bf16.mxu0 %v843_v0  ;;  %639 = vmatprep.mubr.msk.bf16.mxu0 %vm844_vm0, %v843_v0  ;;  %v713_v3 = vld [vmem:[#allocation2 + $0x10] sm:$0xff]   ;;  %v719_v4 = vld [vmem:[#allocation4] sm:$0xff]   ;;  %v714_v5 = vld [vmem:[#allocation2 + $0x18] sm:$0xff]  }
  0x4b   :  { %643 = vmatprep.subr.bf16.mxu1 %v843_v0  ;;  %659 = vmatprep.mubr.msk.bf16.mxu1 %vm844_vm0, %v843_v0  ;;  %v720_v6 = vld [vmem:[#allocation4 + $0x8] sm:$0xff]   ;;  %v715_v7 = vld [vmem:[#allocation2 + $0x20] sm:$0xff]   ;;  %v721_v8 = vld [vmem:[#allocation4 + $0x10] sm:$0xff]   ;;  %v199_v26 = vand.u32 127, %v198_v24 }
  0x4c   :  { %624 = vmatpush3.bf16.msra.mxu0 %v711_v1  ;;  %644 = vmatpush3.bf16.msra.mxu1 %v719_v4  ;;  %v716_v9 = vld [vmem:[#allocation2 + $0x28] sm:$0xff]   ;;  %v722_v10 = vld [vmem:[#allocation4 + $0x18] sm:$0xff]   ;;  %v717_v11 = vld [vmem:[#allocation2 + $0x30] sm:$0xff]  }
  0x4d   :  { %625 = vmatprep.subr.bf16.mxu0 %v843_v0  ;;  %645 = vmatprep.subr.bf16.mxu1 %v843_v0  ;;  %v723_v12 = vld [vmem:[#allocation4 + $0x20] sm:$0xff]   ;;  %v718_v13 = vld [vmem:[#allocation2 + $0x38] sm:$0xff]   ;;  %v724_v14 = vld [vmem:[#allocation4 + $0x28] sm:$0xff]   ;;  %vm200_vm1 = vcmp.lt.s32.totalorder %v199_v26, 24 }
  0x4e   :  { %v86_v15 = vld [vmem:[%s1038_s0] sm:$0xf]  ;;  %v725_v16 = vld [vmem:[#allocation4 + $0x30] sm:$0xff]   ;;  %v726_v17 = vld [vmem:[#allocation4 + $0x38] sm:$0xff]  }
  0x4f   :  { %v727_v18 = vld [vmem:[%s1043_s5] sm:$0xff]   ;;  %v728_v19 = vld [vmem:[%s1043_s5 + $0x8] sm:$0xff]   ;;  %v729_v20 = vld [vmem:[%s1043_s5 + $0x10] sm:$0xff]  }
  0x50   :  { %626 = vmatpush3.bf16.msra.mxu0 %v712_v2  ;;  %646 = vmatpush3.bf16.msra.mxu1 %v720_v6  ;;  %v730_v21 = vld [vmem:[%s1043_s5 + $0x18] sm:$0xff]   ;;  %v731_v22 = vld [vmem:[%s1043_s5 + $0x20] sm:$0xff]   ;;  %v732_v23 = vld [vmem:[%s1043_s5 + $0x28] sm:$0xff]  }
  0x51   :  { %627 = vmatprep.subr.bf16.mxu0 %v843_v0  ;;  %647 = vmatprep.subr.bf16.mxu1 %v843_v0  ;;  %v551_v25 = vld [vmem:[%s1040_s2] ss:$0 sm:$0xff]  ;;  %v733_v35 = vld [vmem:[%s1043_s5 + $0x30] sm:$0xff]   ;;  %v734_v36 = vld [vmem:[%s1043_s5 + $0x38] sm:$0xff]  }
  0x52   :  { %v735_v37 = vld [vmem:[#allocation6] sm:$0xff]   ;;  %v736_v38 = vld [vmem:[#allocation6 + $0x8] sm:$0xff]   ;;  %v737_v39 = vld [vmem:[#allocation6 + $0x10] sm:$0xff]  }
  0x53   :  { %v738_v40 = vld [vmem:[#allocation6 + $0x18] sm:$0xff]   ;;  %v739_v41 = vld [vmem:[#allocation6 + $0x20] sm:$0xff]   ;;  %v740_v42 = vld [vmem:[#allocation6 + $0x28] sm:$0xff]  }
  0x54   :  { %628 = vmatpush3.bf16.msra.mxu0 %v713_v3  ;;  %648 = vmatpush3.bf16.msra.mxu1 %v721_v8  ;;  %v560_v43 = vld [vmem:[%s1042_s4] ss:$0 sm:$0xff]  ;;  %v741_v51 = vld [vmem:[#allocation6 + $0x30] sm:$0xff]   ;;  %v742_v52 = vld [vmem:[#allocation6 + $0x38] sm:$0xff]  }
  0x55   :  { %629 = vmatprep.subr.bf16.mxu0 %v843_v0  ;;  %649 = vmatprep.subr.bf16.mxu1 %v843_v0  ;;  %v569_v53 = vld [vmem:[%s1044_s6] ss:$0 sm:$0xff] }
  0x56   :  { %v578_v61 = vld [vmem:[#allocation7] ss:$0 sm:$0xff] }
  0x58   :  { %630 = vmatpush3.bf16.msra.mxu0 %v714_v5  ;;  %650 = vmatpush3.bf16.msra.mxu1 %v722_v10 }
  0x59   :  { %631 = vmatprep.subr.bf16.mxu0 %v843_v0  ;;  %651 = vmatprep.subr.bf16.mxu1 %v843_v0 }
  0x5c   :  { %632 = vmatpush3.bf16.msra.mxu0 %v715_v7  ;;  %652 = vmatpush3.bf16.msra.mxu1 %v723_v12 }
  0x5d   :  { %633 = vmatprep.subr.bf16.mxu0 %v843_v0  ;;  %653 = vmatprep.subr.bf16.mxu1 %v843_v0 }
  0x60   :  { %634 = vmatpush3.bf16.msra.mxu0 %v716_v9  ;;  %654 = vmatpush3.bf16.msra.mxu1 %v724_v14 }
  0x61   :  { %635 = vmatprep.subr.bf16.mxu0 %v843_v0  ;;  %655 = vmatprep.subr.bf16.mxu1 %v843_v0 }
  0x64   :  { %636 = vmatpush3.bf16.msra.mxu0 %v717_v11  ;;  %656 = vmatpush3.bf16.msra.mxu1 %v725_v16 }
  0x65   :  { %637 = vmatprep.subr.bf16.mxu0 %v843_v0  ;;  %657 = vmatprep.subr.bf16.mxu1 %v843_v0 }
  0x68   :  { %638 = vmatpush3.bf16.msra.mxu0 %v718_v13  ;;  %658 = vmatpush3.bf16.msra.mxu1 %v726_v17 }
  0x69   :  { %663 = vmatprep.subr.bf16.mxu0 %v843_v0  ;;  %683 = vmatprep.subr.bf16.mxu1 %v843_v0 }
  0x6b   :  { %640 = vmatmul.mubr.bf16.vlgmr.msra.gmra.mrb[0].mxu0 %v86_v15 }
  0x6c   :  { %679 = vmatprep.mubr.msk.bf16.mxu0 %vm844_vm0, %v843_v0  ;;  %664 = vmatpush3.bf16.msra.mxu0 %v727_v18 }
  0x6d   :  { %665 = vmatprep.subr.bf16.mxu0 %v843_v0 }
  0x70   :  { %666 = vmatpush3.bf16.msra.mxu0 %v728_v19 }
  0x71   :  { %667 = vmatprep.subr.bf16.mxu0 %v843_v0 }
  0x74   :  { %668 = vmatpush3.bf16.msra.mxu0 %v729_v20 }
  0x75   :  { %669 = vmatprep.subr.bf16.mxu0 %v843_v0 }
  0x78   :  { %670 = vmatpush3.bf16.msra.mxu0 %v730_v21 }
  0x79   :  { %671 = vmatprep.subr.bf16.mxu0 %v843_v0 }
  0x7c   :  { %672 = vmatpush3.bf16.msra.mxu0 %v731_v22 }
  0x7d   :  { %673 = vmatprep.subr.bf16.mxu0 %v843_v0 }
  0x80   :  { %674 = vmatpush3.bf16.msra.mxu0 %v732_v23 }
  0x81   :  { %675 = vmatprep.subr.bf16.mxu0 %v843_v0 }
  0x84   :  { %676 = vmatpush3.bf16.msra.mxu0 %v733_v35 }
  0x85   :  { %677 = vmatprep.subr.bf16.mxu0 %v843_v0 }
  0x88   :  { %678 = vmatpush3.bf16.msra.mxu0 %v734_v36 }
 0x13e   :  { %v192_v27 = vpop.f32.mrb[0].mxu0 }
 0x13f   :  { %v193_v28 = vadd.f32 %v551_v25, %v192_v27  ;;  %v641_v29 = vpop.f32.mrb[1].mxu0 }
 0x140   :  { %v195_v30 = vpop.f32.mrb[2].mxu0 }
 0x141   :  { %v201_v31 = vmax.f32 %v193_v28, 0.0  ;;  %v642_v32 = vpop.f32.mrb[3].mxu0 }
 0x143   :  { %v204_v33 = vsel %vm200_vm1, %v201_v31, %v193_v28 }
 0x144   :  { %v205_v34 = vpack.c.bf16 %v204_v33, %v204_v33 }
 0x146   :  { %660 = vmatmul.mubr.bf16.vlgmr.msra.gmra.mrb[0].mxu1 %v205_v34 }
 0x147   :  { %699 = vmatprep.mubr.msk.bf16.mxu1 %vm844_vm0, %v843_v0  ;;  %684 = vmatpush3.bf16.msra.mxu1 %v735_v37 }
 0x148   :  { %685 = vmatprep.subr.bf16.mxu1 %v843_v0 }
 0x14b   :  { %686 = vmatpush3.bf16.msra.mxu1 %v736_v38 }
 0x14c   :  { %687 = vmatprep.subr.bf16.mxu1 %v843_v0 }
 0x14f   :  { %688 = vmatpush3.bf16.msra.mxu1 %v737_v39 }
 0x150   :  { %689 = vmatprep.subr.bf16.mxu1 %v843_v0 }
 0x153   :  { %690 = vmatpush3.bf16.msra.mxu1 %v738_v40 }
 0x154   :  { %691 = vmatprep.subr.bf16.mxu1 %v843_v0 }
 0x157   :  { %692 = vmatpush3.bf16.msra.mxu1 %v739_v41 }
 0x158   :  { %693 = vmatprep.subr.bf16.mxu1 %v843_v0 }
 0x15b   :  { %694 = vmatpush3.bf16.msra.mxu1 %v740_v42 }
 0x15c   :  { %695 = vmatprep.subr.bf16.mxu1 %v843_v0 }
 0x15f   :  { %696 = vmatpush3.bf16.msra.mxu1 %v741_v51 }
 0x160   :  { %697 = vmatprep.subr.bf16.mxu1 %v843_v0 }
 0x163   :  { %698 = vmatpush3.bf16.msra.mxu1 %v742_v52 }
 0x219   :  { %v311_v44 = vpop.f32.mrb[0].mxu1 }
 0x21a   :  { %v312_v45 = vadd.f32 %v560_v43, %v311_v44  ;;  %v661_v46 = vpop.f32.mrb[1].mxu1 }
 0x21b   :  { %v314_v47 = vpop.f32.mrb[2].mxu1 }
 0x21c   :  { %v317_v48 = vmax.f32 %v312_v45, 0.0  ;;  %v662_v49 = vpop.f32.mrb[3].mxu1 }
 0x21e   :  { %v318_v50 = vpack.c.bf16 %v317_v48, %v317_v48 }
 0x220   :  { %680 = vmatmul.mubr.bf16.vlgmr.msra.gmra.mrb[4].mxu0 %v318_v50 }
 0x2f3   :  { %v424_v54 = vpop.f32.mrb[4].mxu0 }
 0x2f4   :  { %v425_v55 = vadd.f32 %v569_v53, %v424_v54  ;;  %v681_v56 = vpop.f32.mrb[5].mxu0 }
 0x2f5   :  { %v427_v57 = vpop.f32.mrb[6].mxu0 }
 0x2f6   :  { %v430_v58 = vmax.f32 %v425_v55, 0.0  ;;  %v682_v59 = vpop.f32.mrb[7].mxu0 }
 0x2f8   :  { %v431_v60 = vpack.c.bf16 %v430_v58, %v430_v58 }
 0x2fa   :  { %700 = vmatmul.mubr.bf16.vlgmr.msra.gmra.mrb[4].mxu1 %v431_v60 }
 0x3cd   :  { %v537_v62 = vpop.f32.mrb[4].mxu1 }
 0x3ce   :  { %v538_v63 = vadd.f32 %v578_v61, %v537_v62  ;;  %v701_v1 = vpop.f32.mrb[5].mxu1 }
 0x3cf   :  { %v540_v2 = vpop.f32.mrb[6].mxu1 }
 0x3d0   :  { %543 = vst [vmem:[%s1047_s9] sm:$0xff] %v538_v63  ;;  %v702_v0 = vpop.f32.mrb[7].mxu1 }
 0x3d1   :  { %548 = vsyncpa [#allocation3], 1 }
 0x3d2   :  { %549 = vsyncpa [#allocation5], 1 }
 0x3d3   :  { %550 = vsyncpa [#allocation8], 1 }

</bundles_post_ra>
